<compile_context>
chip_gen: v6e
topology: v6e:2x2x1
jax: 0.10.0
libtpu: 0.0.40
codegen_flags: <defaults>
</compile_context>

<pallas_src>
import jax
import jax.numpy as jnp
import numpy as np
from jax.experimental import pallas as pl
from jax.experimental.pallas import tpu as pltpu


# ----------------------------------------------------------------------------
# Pallas kernel: fused fc head  (x_tile @ W^T + b)  on one row-tile.
# ----------------------------------------------------------------------------
def triplet_fc_kernel(x_ref, w_ref, b_ref, out_ref):
    # x_ref: (TM, E)   w_ref: (E, P) (pre-transposed)   b_ref: (1, P)   out_ref: (TM, P)
    acc = jnp.dot(
        x_ref[...],
        w_ref[...],
        preferred_element_type=jnp.float32,
        precision=jax.lax.Precision.HIGHEST,
    )
    out_ref[...] = (acc + b_ref[...]).astype(out_ref.dtype)


def _row_tiling(M, tm_target=4096):
    """Pick (TM, M_pad): TM a multiple of 8, M_pad = grid * TM >= M.

    Targets ~tm_target rows per step (>= ~0.5 MiB of f32 x at E=32) and at least
    two grid steps when M permits, so v7x's two TensorCores both get work.
    """
    rup = lambda x, m: ((x + m - 1) // m) * m
    m8 = rup(max(M, 1), 8)
    if m8 <= 8:
        return m8, m8                      # single tiny tile
    if m8 <= 2 * tm_target:
        tm = rup((m8 + 1) // 2, 8)         # exactly two tiles
        return tm, 2 * tm
    tm = tm_target
    return tm, rup(m8, tm)


def triplet_fc(x2d, w_fc_t, b_fc_2d, *, tm_target=4096):
    """(M, E) @ (E, P) + (1, P) -> (M, P) through a single pallas_call."""
    M, E = x2d.shape
    P = w_fc_t.shape[1]
    TM, M_pad = _row_tiling(M, tm_target)
    if M_pad != M:
        # Zero-pad rows; padded rows produce (bias-only) garbage that is sliced off.
        x2d = jnp.pad(x2d, ((0, M_pad - M), (0, 0)))
    grid = (M_pad // TM,)

    out = pl.pallas_call(
        triplet_fc_kernel,
        out_shape=jax.ShapeDtypeStruct((M_pad, P), x2d.dtype),
        grid_spec=pltpu.PrefetchScalarGridSpec(
            num_scalar_prefetch=0,
            grid=grid,
            in_specs=[
                pl.BlockSpec((TM, E), lambda i: (i, 0)),   # anchor embedding rows
                pl.BlockSpec((E, P), lambda i: (0, 0)),    # fc weight, pre-transposed
                pl.BlockSpec((1, P), lambda i: (0, 0)),    # fc bias
            ],
            out_specs=pl.BlockSpec((TM, P), lambda i: (i, 0)),
        ),
        compiler_params=pltpu.CompilerParams(
            # Independent row tiles -> megacore sharding on v7x; no-op on v5e/v6e.
            dimension_semantics=("parallel",),
        ),
    )(x2d, w_fc_t, b_fc_2d)

    return out[:M] if M_pad != M else out


# ----------------------------------------------------------------------------
# Triplet.forward
# ----------------------------------------------------------------------------
def triplet_forward(anchor_x, positive_x, negative_x, params):
    """Returns (enc_anchor, enc_positive, enc_negative, pred) like Triplet.forward."""
    # Encoder is abstract in the spec -> identity pass-through (no kernel work).
    # TODO(synk): fuse the fc head into the concrete encoder kernel once one exists;
    #             at E=32/P=8 the pallas_call launch dominates the ~100 ns of compute.
    enc_anchor, enc_positive, enc_negative = anchor_x, positive_x, negative_x

    B, N, E = enc_anchor.shape
    P = params['w_fc'].shape[0]                 # n_pred
    x2d = enc_anchor.reshape(B * N, E)          # fold batch into rows
    w_t = params['w_fc'].T.astype(x2d.dtype)    # (E, P): transpose once in the wrapper
    b2d = params['b_fc'].reshape(1, P).astype(jnp.float32)

    pred = triplet_fc(x2d, w_t, b2d).reshape(B, N, P)
    return enc_anchor, enc_positive, enc_negative, pred


# ----------------------------------------------------------------------------
# Pure-JAX reference for a correctness check.
# ----------------------------------------------------------------------------
def triplet_reference(anchor_x, positive_x, negative_x, params):
    pred = (
        jnp.matmul(anchor_x, params['w_fc'].T, precision=jax.lax.Precision.HIGHEST)
        + params['b_fc']
    )
    return anchor_x, positive_x, negative_x, pred


# ----------------------------------------------------------------------------
# Deterministic parameter init + run.
# ----------------------------------------------------------------------------
def make_params(key, enc_dim, n_pred):
    k_w, k_b = jax.random.split(key)
    bound = 1.0 / np.sqrt(enc_dim)
    # nn.Linear(enc_dim, n_pred): weight (n_pred, enc_dim), bias (n_pred,)
    w_fc = jax.random.uniform(k_w, (n_pred, enc_dim), jnp.float32, -bound, bound)
    b_fc = jax.random.uniform(k_b, (n_pred,), jnp.float32, -bound, bound)
    return dict(w_fc=w_fc, b_fc=b_fc)


if __name__ == "__main__":
    B, N, ENC_DIM, N_PRED = 2, 16, 32, 8

    key = jax.random.PRNGKey(0)
    k_p, k_a, k_pos, k_neg = jax.random.split(key, 4)
    params = make_params(k_p, ENC_DIM, N_PRED)
    anchor_x = jax.random.normal(k_a, (B, N, ENC_DIM), jnp.float32)
    positive_x = jax.random.normal(k_pos, (B, N, ENC_DIM), jnp.float32)
    negative_x = jax.random.normal(k_neg, (B, N, ENC_DIM), jnp.float32)

    enc_a, enc_p, enc_n, pred = triplet_forward(anchor_x, positive_x, negative_x, params)
    pred = jax.block_until_ready(pred)

    ref_a, ref_p, ref_n, ref_pred = triplet_reference(anchor_x, positive_x, negative_x, params)
    ref_pred = jax.block_until_ready(ref_pred)

    assert pred.shape == (B, N, N_PRED), pred.shape
    assert pred.dtype == anchor_x.dtype, pred.dtype
    np.testing.assert_allclose(np.asarray(enc_a), np.asarray(ref_a), rtol=0, atol=0)
    np.testing.assert_allclose(np.asarray(enc_p), np.asarray(ref_p), rtol=0, atol=0)
    np.testing.assert_allclose(np.asarray(enc_n), np.asarray(ref_n), rtol=0, atol=0)
    np.testing.assert_allclose(np.asarray(pred), np.asarray(ref_pred), rtol=1e-6, atol=1e-6)

    print("KERNEL_OK")
</pallas_src>

<mosaic_0001>
module attributes {stable_mosaic.version = 11 : i64} {
  func.func @triplet_fc_kernel(%arg0: i32, %arg1: memref<16x32xf32, #tpu.memory_space<vmem>>, %arg2: memref<32x8xf32, #tpu.memory_space<vmem>>, %arg3: memref<1x8xf32, #tpu.memory_space<vmem>>, %arg4: memref<16x8xf32, #tpu.memory_space<vmem>>) attributes {dimension_semantics = [#tpu.dimension_semantics<parallel>], iteration_bounds = array<i64: 2>, scalar_prefetch = 0 : i64, scratch_operands = 0 : i64, tpu.core_type = #tpu.core_type<tc>, window_params = [{transform_indices = @transform_0, window_bounds = array<i64: 16, 32>}, {pipeline_mode = #tpu.pipeline_mode<synchronous>, transform_indices = @transform_1, window_bounds = array<i64: 32, 8>}, {pipeline_mode = #tpu.pipeline_mode<synchronous>, transform_indices = @transform_2, window_bounds = array<i64: 1, 8>}, {transform_indices = @transform_3, window_bounds = array<i64: 16, 8>}]} {
    %c0 = arith.constant 0 : index
    %c0_0 = arith.constant 0 : index
    %0 = vector.load %arg1[%c0, %c0_0] : memref<16x32xf32, #tpu.memory_space<vmem>>, vector<16x32xf32>
    %c0_1 = arith.constant 0 : index
    %c0_2 = arith.constant 0 : index
    %1 = vector.load %arg2[%c0_1, %c0_2] : memref<32x8xf32, #tpu.memory_space<vmem>>, vector<32x8xf32>
    %cst = arith.constant dense<0.000000e+00> : vector<16x8xf32>
    %2 = tpu.matmul %0, %1, %cst {dimension_numbers = #tpu.dot_dimension_numbers<[1], [0], [0], [1], [0, 0, 1, 1], [], []>, precision = #tpu.contract_precision<fp32>} : vector<16x32xf32>, vector<32x8xf32>, vector<16x8xf32> -> vector<16x8xf32>
    %c0_3 = arith.constant 0 : index
    %c0_4 = arith.constant 0 : index
    %3 = vector.load %arg3[%c0_3, %c0_4] : memref<1x8xf32, #tpu.memory_space<vmem>>, vector<1x8xf32>
    %4 = vector.broadcast %3 : vector<1x8xf32> to vector<16x8xf32>
    %5 = arith.addf %2, %4 : vector<16x8xf32>
    %c0_5 = arith.constant 0 : index
    %c0_6 = arith.constant 0 : index
    %6 = vector.load %arg4[%c0_5, %c0_6] : memref<16x8xf32, #tpu.memory_space<vmem>>, vector<16x8xf32>
    tpu.vector_store %arg4[%c0_5, %c0_6], %5 {strides = array<i32>} : memref<16x8xf32, #tpu.memory_space<vmem>>, vector<16x8xf32>,
    return
  }
  func.func @transform_0(%arg0: i32) -> (i32, i32) {
    %c0_i32 = arith.constant 0 : i32
    %c0_i32_0 = arith.constant 0 : i32
    return %arg0, %c0_i32 : i32, i32
  }
  func.func @transform_1(%arg0: i32) -> (i32, i32) {
    %c0_i32 = arith.constant 0 : i32
    %c0_i32_0 = arith.constant 0 : i32
    %c0_i32_1 = arith.constant 0 : i32
    return %c0_i32, %c0_i32_0 : i32, i32
  }
  func.func @transform_2(%arg0: i32) -> (i32, i32) {
    %c0_i32 = arith.constant 0 : i32
    %c0_i32_0 = arith.constant 0 : i32
    %c0_i32_1 = arith.constant 0 : i32
    return %c0_i32, %c0_i32_0 : i32, i32
  }
  func.func @transform_3(%arg0: i32) -> (i32, i32) {
    %c0_i32 = arith.constant 0 : i32
    %c0_i32_0 = arith.constant 0 : i32
    return %arg0, %c0_i32 : i32, i32
  }
}

</mosaic_0001>

<bundles_post_ra>
// kernel: tpu_custom_call.1
= control target key start
LH: loop header
LB: loop body
LE: loop exit
PB: predicated region body
PF: predicated region fallthrough
CT: control target
= control target key end

     0   :  { %s931_s12 = smov 0   ;;  %s1026_s0 = inlined_call_operand.vmem [shape: f32[32,32], index: 0, kind: input, shape index: {}]   ;;  %s1027_s1 = inlined_call_operand.vmem [shape: f32[32,8], index: 1, kind: input, shape index: {}]   ;;  %s1028_s2 = inlined_call_operand.vmem [shape: f32[1,8], index: 2, kind: input, shape index: {}]   ;;  %s1029_s3 = inlined_call_operand.vmem [shape: f32[32,8], index: 3, kind: output, shape index: {}]  }
   0x1 LB: > { %s781_s13 = sadd.s32 4294967295, %s909_s12   ;;  %p785_p0 = scmp.ge.s32.totalorder %s909_s12, 1  ;;  %s909_s12 = sphi %s931_s12, %s13_s12  }
   0x2   : > { %p138_p1 = scmp.lt.s32.totalorder %s909_s12, 3 }
   0x4   : > { %p139_p2 = pnand %p785_p0, %p138_p1 }
   0x5   : > { %s786_s20 = sshll.u32 (!%p139_p2), %s781_s13, 1 }
   0x6   : > { %142 = sbr.rel (%p139_p2) target bundleno = 248 (0xf8), region = 32  ;;  %p163_p3 = scmp.lt.s32.totalorder (!%p139_p2), %s786_s20, 3 }
   0xb   : > { %v179_v0 = vld [vmem:[%s1027_s1 + $0x18] sm:$0xff]  ;;  %v178_v1 = vld [vmem:[%s1027_s1 + $0x10] sm:$0xff]  ;;  %v177_v2 = vld [vmem:[%s1027_s1 + $0x8] sm:$0xff]  ;;  %s1031_s20 = smov (!%p163_p3, %s786_s20), 3  ;;  %vm187_vm0 = vcmask 261120   ;;  %vm722_vm1 = vcmask 64512  }
   0xc   : > { %v948_v3 = vand.u32 4294901760, %v179_v0  ;;  %v950_v4 = vand.u32 4294901760, %v178_v1  ;;  %v952_v5 = vand.u32 4294901760, %v177_v2  ;;  %v176_v6 = vld [vmem:[%s1027_s1] sm:$0xff]  ;;  %s787_s23 = sshll.u32 %s1031_s20, 3 }
   0xd   : > { %v957_v7 = vand.u32 4294901760, %v176_v6  ;;  %s166_s26 = scalar_lea.vmem %s1026_s0, %s787_s23  ;;  %v790_v39 = vld [vmem:[%s1028_s2] ss:$0 sm:$0xff]  ;;  %s172_s4 = scalar_lea.vmem %s1029_s3, %s787_s23 }
   0xe   : > { %829 = vmatprep.subr.mxu0 %v948_v3  ;;  %v309_v8 = vsub.f32 %v179_v0, %v948_v3  ;;  %v316_v9 = vsub.f32 %v178_v1, %v950_v4  ;;  %v323_v10 = vsub.f32 %v177_v2, %v952_v5  ;;  %v174_v19 = vld [vmem:[%s166_s26] sm:$0xff]  ;;  %v175_v20 = vld [vmem:[%s166_s26 + $0x8] sm:$0xff] }
   0xf   : > { %830 = vmatpush3.msra.mxu0 %v948_v3  ;;  %v330_v11 = vsub.f32 %v176_v6, %v957_v7  ;;  %v189_v21 = vsel %vm187_vm0, %v174_v19, 0  ;;  %v192_v22 = vsel %vm187_vm0, %v175_v20, 0 }
  0x10   : > { %v967_v12 = vand.u32 4294901760, %v309_v8  ;;  %831 = vmatprep.subr.mxu0 %v950_v4  ;;  %v970_v13 = vand.u32 4294901760, %v316_v9  ;;  %v972_v14 = vand.u32 4294901760, %v323_v10  ;;  %v263_v26 = vand.u32 4294901760, %v189_v21 }
  0x11   : > { %832 = vmatpush3.msra.mxu0 %v950_v4  ;;  %v976_v15 = vand.u32 4294901760, %v330_v11  ;;  %v273_v27 = vand.u32 4294901760, %v192_v22 }
  0x12   : > { %v311_v16 = vsub.f32 %v309_v8, %v967_v12  ;;  %v318_v17 = vsub.f32 %v316_v9, %v970_v13  ;;  %833 = vmatprep.subr.mxu0 %v952_v5  ;;  %v325_v18 = vsub.f32 %v323_v10, %v972_v14  ;;  %v264_v29 = vsub.f32 %v189_v21, %v263_v26 }
  0x13   : > { %834 = vmatpush3.msra.mxu0 %v952_v5  ;;  %v332_v25 = vsub.f32 %v330_v11, %v976_v15  ;;  %848 = vmatprep.mubr.f32.mxu1 %v263_v26  ;;  %v274_v30 = vsub.f32 %v192_v22, %v273_v27 }
  0x14   : > { %v312_v23 = vand.u32 4294901760, %v311_v16  ;;  %v319_v24 = vand.u32 4294901760, %v318_v17  ;;  %835 = vmatprep.subr.mxu0 %v957_v7  ;;  %v326_v28 = vand.u32 4294901760, %v325_v18  ;;  %v265_v32 = vand.u32 4294901760, %v264_v29 }
  0x15   : > { %836 = vmatpush3.msra.mxu0 %v957_v7  ;;  %v333_v31 = vand.u32 4294901760, %v332_v25  ;;  %v275_v33 = vand.u32 4294901760, %v274_v30 }
  0x16   : > { %840 = vmatprep.subr.mxu1 %v312_v23  ;;  %851 = vmatprep.subr.mxu0 %v309_v8  ;;  %v266_v34 = vsub.f32 %v264_v29, %v265_v32 }
  0x17   : > { %841 = vmatpush3.msra.mxu1 %v312_v23  ;;  %v276_v35 = vsub.f32 %v274_v30, %v275_v33 }
  0x18   : > { %842 = vmatprep.subr.mxu1 %v319_v24  ;;  %v267_v36 = vand.u32 4294901760, %v266_v34 }
  0x19   : > { %843 = vmatpush3.msra.mxu1 %v319_v24  ;;  %v277_v37 = vand.u32 4294901760, %v276_v35 }
  0x1a   : > { %844 = vmatprep.subr.mxu1 %v326_v28  ;;  %837 = vmatprep.mubr.f32.mxu0 %v267_v36 }
  0x1b   : > { %845 = vmatpush3.msra.mxu1 %v326_v28  ;;  %838 = vmatmul.mubr.f32.vlgmr.msra.gmra.mxu0 %v277_v37 }
  0x1c   : > { %846 = vmatprep.subr.mxu1 %v333_v31  ;;  %852 = vmatpush3.msra.mxu0 %v309_v8 }
  0x1d   : > { %847 = vmatpush3.msra.mxu1 %v333_v31  ;;  %853 = vmatprep.subr.mxu0 %v316_v9 }
  0x1e   : > { %862 = vmatprep.subr.mxu1 %v948_v3  ;;  %849 = vmatmul.mubr.f32.vlgmr.msra.gmra.mxu1 %v273_v27 }
  0x1f   : > { %863 = vmatpush3.msra.mxu1 %v948_v3  ;;  %854 = vmatpush3.msra.mxu0 %v316_v9 }
  0x20   : > { %864 = vmatprep.subr.mxu1 %v950_v4  ;;  %855 = vmatprep.subr.mxu0 %v323_v10 }
  0x21   : > { %865 = vmatpush3.msra.mxu1 %v950_v4  ;;  %856 = vmatpush3.msra.mxu0 %v323_v10 }
  0x22   : > { %866 = vmatprep.subr.mxu1 %v952_v5  ;;  %857 = vmatprep.subr.mxu0 %v330_v11 }
  0x23   : > { %867 = vmatpush3.msra.mxu1 %v952_v5  ;;  %858 = vmatpush3.msra.mxu0 %v330_v11 }
  0x24   : > { %868 = vmatprep.subr.mxu1 %v957_v7  ;;  %859 = vmatprep.mubr.f32.mxu0 %v264_v29 }
  0x25   : > { %869 = vmatpush3.msra.mxu1 %v957_v7  ;;  %860 = vmatmul.mubr.f32.vlgmr.msra.gmra.mxu0 %v274_v30 }
  0x26   : > { %870 = vmatprep.mubr.f32.mxu1 %v265_v32  ;;  %873 = vmatprep.subr.mxu0 %v967_v12 }
  0x27   : > { %884 = vmatprep.subr.mxu1 %v948_v3  ;;  %871 = vmatmul.mubr.f32.vlgmr.msra.gmra.mxu1 %v275_v33 }
  0x28   : > { %874 = vmatpush3.msra.mxu0 %v967_v12  ;;  %885 = vmatpush3.msra.mxu1 %v948_v3 }
  0x29   : > { %875 = vmatprep.subr.mxu0 %v970_v13  ;;  %886 = vmatprep.subr.mxu1 %v950_v4 }
  0x2a   : > { %876 = vmatpush3.msra.mxu0 %v970_v13  ;;  %887 = vmatpush3.msra.mxu1 %v950_v4 }
  0x2b   : > { %877 = vmatprep.subr.mxu0 %v972_v14  ;;  %888 = vmatprep.subr.mxu1 %v952_v5 }
  0x2c   : > { %878 = vmatpush3.msra.mxu0 %v972_v14  ;;  %889 = vmatpush3.msra.mxu1 %v952_v5 }
  0x2d   : > { %879 = vmatprep.subr.mxu0 %v976_v15  ;;  %890 = vmatprep.subr.mxu1 %v957_v7 }
  0x2e   : > { %880 = vmatpush3.msra.mxu0 %v976_v15  ;;  %881 = vmatprep.mubr.f32.mxu0 %v263_v26 }
  0x2f   : > { %891 = vmatpush3.msra.mxu1 %v957_v7  ;;  %892 = vmatprep.mubr.f32.mxu1 %v263_v26 }
  0x30   : > { %882 = vmatmul.mubr.f32.vlgmr.msra.gmra.mxu0 %v273_v27  ;;  %893 = vmatmul.mubr.f32.vlgmr.msra.gmra.mxu1 %v273_v27 }
  0xdb   : > { %v839_v38 = vpop.f32.mrf.mxu0 }
  0xdc   : > { %v280_v42 = vadd.f32 %v839_v38, %v790_v39 }
  0xdd   : > { %v269_v41 = vpop.f32.mrf.mxu0 }
  0xde   : > { %v850_v40 = vpop.f32.mrf.mxu1  ;;  %v270_v44 = vadd.f32 %v790_v39, %v269_v41 }
  0xdf   : > { %v377_v46 = vadd.f32 %v850_v40, %v280_v42 }
  0xe0   : > { %v370_v45 = vpop.f32.mrf.mxu1 }
  0xe1   : > { %v371_v49 = vadd.f32 %v370_v45, %v270_v44 }
  0xe5   : > { %v861_v43 = vpop.f32.mrf.mxu0 }
  0xe6   : > { %v464_v50 = vadd.f32 %v861_v43, %v377_v46 }
  0xe7   : > { %v872_v47 = vpop.f32.mrf.mxu1  ;;  %v456_v48 = vpop.f32.mrf.mxu0 }
  0xe8   : > { %v457_v51 = vadd.f32 %v456_v48, %v371_v49  ;;  %v549_v53 = vadd.f32 %v872_v47, %v464_v50 }
  0xe9   : > { %v540_v52 = vpop.f32.mrf.mxu1 }
  0xea   : > { %v541_v56 = vadd.f32 %v540_v52, %v457_v51 }
  0xf0   : > { %v883_v54 = vpop.f32.mrf.mxu0  ;;  %v894_v55 = vpop.f32.mrf.mxu1 }
  0xf1   : > { %v638_v57 = vadd.f32 %v883_v54, %v549_v53 }
  0xf2   : > { %v631_v58 = vpop.f32.mrf.mxu0  ;;  %v712_v60 = vpop.f32.mrf.mxu1 }
  0xf3   : > { %v632_v59 = vadd.f32 %v631_v58, %v541_v56  ;;  %v719_v62 = vadd.f32 %v894_v55, %v638_v57 }
  0xf5   : > { %v713_v61 = vadd.f32 %v712_v60, %v632_v59  ;;  %724 = vst.msk [vmem:[%s172_s4 + $0x8] sm:$0xff] %vm722_vm1, %v719_v62 }
  0xf7   : > { %723 = vst.msk [vmem:[%s172_s4] sm:$0xff] %vm722_vm1, %v713_v61 }
  0xf8 PF: > { %s13_s12 = sadd.s32 1, %s909_s12  }
  0xf9   : > { %p10_p4 = scmp.ge.s32.totalorder %s13_s12, 4  }
  0xfb   :  { %12 = sbr.rel (!%p10_p4) target bundleno = 1 (0x1), region = 62 }

</bundles_post_ra>
